<compile_context>
chip_gen: v5e
topology: v5e:2x2
jax: 0.10.0
libtpu: 0.0.40
codegen_flags: <defaults>
</compile_context>

<pallas_src>
import functools

import jax
import jax.numpy as jnp
from jax.experimental import pallas as pl
from jax.experimental.pallas import tpu as pltpu


def _round_up(x, m):
    return ((x + m - 1) // m) * m


def _centroid_loss_kernel(h_ref, c_ref, y_ref, psum_ref, reg_ref, acc_ref, csq_ref,
                          *, batch, num_classes, tiles_per_chunk):
    chunk = pl.program_id(0)
    step = pl.program_id(1)
    tb = h_ref.shape[0]
    d = h_ref.shape[1]
    k_pad = c_ref.shape[0]

    # --- once per chunk: zero the accumulator, hoist the center norms ---
    @pl.when(step == 0)
    def _init():
        acc_ref[...] = jnp.zeros_like(acc_ref)
        c32 = c_ref[...].astype(jnp.float32)
        csq_ref[...] = jnp.sum(c32 * c32, axis=1, keepdims=True)        # (K_pad, 1)

    h_raw = h_ref[...]                                                   # (TB, D) native dtype
    y = y_ref[...]                                                       # (1, TB) int32

    # ---- pairwise squared distances, class axis on sublanes ----
    # ||h_i - c_k||^2 = ||c_k||^2 + ||h_i||^2 - 2 c_k . h_i
    ch = jax.lax.dot_general(c_ref[...], h_raw, (((1,), (1,)), ((), ())),
                             preferred_element_type=jnp.float32)         # (K_pad, TB)
    h32 = h_raw.astype(jnp.float32)
    hh = h32 * h32                                                       # (TB, D), f32 VPU math
    ones_lhs = jnp.ones((k_pad, d), jnp.float32)
    hsq = jax.lax.dot_general(ones_lhs, hh, (((1,), (1,)), ((), ())),
                              preferred_element_type=jnp.float32)        # (K_pad, TB), rows equal
    norm_sq = jnp.maximum(csq_ref[...] + hsq - 2.0 * ch, 0.0)            # (K_pad, TB)

    k_ids = jax.lax.broadcasted_iota(jnp.int32, (k_pad, tb), 0)

    # attractive term: norm_sq[y_i, i] via one-hot (padded class rows never match a
    # valid label); sublane reduction over K_pad rows.
    onehot = (k_ids == y).astype(jnp.float32)
    distance = jnp.sum(norm_sq * onehot, axis=0, keepdims=True)          # (1, TB)

    # repulsive term: logsumexp_k(-sqrt(norm_sq)) over the real classes only.
    neg_d = -jnp.sqrt(norm_sq)
    if k_pad != num_classes:                                             # static branch
        neg_d = jnp.where(k_ids < num_classes, neg_d, -jnp.inf)
    m = jnp.max(neg_d, axis=0, keepdims=True)                            # (1, TB)
    p = jnp.exp(neg_d - m)
    logsum = jnp.log(jnp.sum(p, axis=0, keepdims=True)) + m              # (1, TB)

    # mask out-of-range samples (ragged last tile / duplicated clamp tiles). NaN/garbage
    # from unspecified OOB rows stays inside its own lane column and is selected away.
    tile_idx = chunk * tiles_per_chunk + step
    col_ids = jax.lax.broadcasted_iota(jnp.int32, (1, tb), 1)
    col_valid = (tile_idx * tb + col_ids) < batch
    acc_ref[...] += jnp.where(col_valid, distance + logsum, 0.0)         # lane-dense acc

    @pl.when(step == pl.num_programs(1) - 1)
    def _finalize():
        psum_ref[...] = jnp.sum(acc_ref[...], axis=(0, 1), keepdims=True)

        # centre-repulsion regularizer: sum_k -min_{j!=k} log ||C_k - C_j||^2.
        # Tiny (K_pad x K_pad); computed once per chunk.
        c32 = c_ref[...].astype(jnp.float32)
        cc = jax.lax.dot_general(c32, c32, (((1,), (1,)), ((), ())),
                                 preferred_element_type=jnp.float32)     # (K_pad, K_pad)
        csq = csq_ref[...]
        pdist = jnp.maximum(csq + csq.T - 2.0 * cc, 0.0)
        r = jax.lax.broadcasted_iota(jnp.int32, (k_pad, k_pad), 0)
        cix = jax.lax.broadcasted_iota(jnp.int32, (k_pad, k_pad), 1)
        invalid = (r == cix) | (r >= num_classes) | (cix >= num_classes)
        pdist = jnp.where(invalid, jnp.inf, pdist)
        # min before log (log is monotonic): K_pad logs instead of K_pad^2.
        log_min = jnp.log(jnp.min(pdist, axis=-1, keepdims=True))        # (K_pad, 1)
        rr = jax.lax.broadcasted_iota(jnp.int32, (k_pad, 1), 0)
        reg_ref[...] = jnp.sum(jnp.where(rr < num_classes, -log_min, 0.0),
                               axis=(0, 1), keepdims=True)


def centroid_loss(h, centers, y, *, rho=1.0, max_block_rows=None,
                  vmem_fraction=0.7, num_parallel_chunks=2):
    """h: (B, D) float, centers: (K, D) float, y: (B,) int -> scalar float32 loss."""
    B, D = h.shape
    K, Dc = centers.shape
    assert D == Dc
    assert y.shape == (B,)

    # Class axis lives on sublanes: pad K to a multiple of 8 (centers are tiny).
    K_pad = _round_up(max(K, 1), 8)
    c_p = jnp.pad(centers.astype(h.dtype), ((0, K_pad - K), (0, 0)))

    # Generation-aware VMEM budget (v5e/v6e: 128 MiB, v7x: 64 MiB per TensorCore).
    try:
        vmem_cap = int(pltpu.get_tpu_info().vmem_capacity_bytes)
    except Exception:
        vmem_cap = 64 * 1024 * 1024
    vmem_limit = int(vmem_cap * vmem_fraction)
    if max_block_rows is None:
        max_block_rows = 4096 if vmem_cap >= 96 * 1024 * 1024 else 1024

    itemsize = jnp.dtype(h.dtype).itemsize
    # Per-batch-row VMEM: double-buffered h/y tiles + f32 temporaries of shape (TB, D)
    # and (K_pad, TB) + the lane-dense accumulator.
    bytes_per_row = 2 * D * itemsize + 2 * 4 + 3 * 4 * D + 6 * 4 * K_pad + 4
    # Fixed: resident (possibly double-buffered) centers block + compiler headroom.
    fixed_bytes = 2 * K_pad * D * itemsize + 4 * K_pad + (2 << 20)
    budget_rows = max(128, (vmem_limit - fixed_bytes) // bytes_per_row)

    tb_cap = (B // 128) * 128 if B >= 128 else 128
    TB = min(max_block_rows, budget_rows, tb_cap)
    TB = max(128, (TB // 128) * 128)

    # Only tiny batches (< one 128-row tile) are padded; larger batches stream the
    # original arrays un-copied and the ragged last tile is masked inside the kernel.
    if B < TB:
        h = jnp.pad(h, ((0, TB - B), (0, 0)))
        y = jnp.pad(y, (0, TB - B))
    y2d = y.astype(jnp.int32).reshape(1, -1)                 # labels on lanes

    num_tiles = pl.cdiv(B, TB)
    chunks = max(1, min(num_parallel_chunks, num_tiles))     # "parallel" grid axis
    tiles_per_chunk = pl.cdiv(num_tiles, chunks)
    last_blk = num_tiles - 1

    def h_map(c, t):
        return (jnp.minimum(c * tiles_per_chunk + t, last_blk), 0)

    def y_map(c, t):
        return (0, jnp.minimum(c * tiles_per_chunk + t, last_blk))

    # Deeper buffering only pays off for many tiny tiles.
    if TB < 512 and tiles_per_chunk >= 4:
        h_spec = pl.BlockSpec((TB, D), h_map, pipeline_mode=pl.Buffered(3))
        y_spec = pl.BlockSpec((1, TB), y_map, pipeline_mode=pl.Buffered(3))
    else:
        h_spec = pl.BlockSpec((TB, D), h_map)
        y_spec = pl.BlockSpec((1, TB), y_map)
    c_spec = pl.BlockSpec((K_pad, D), lambda c, t: (0, 0))   # centers stay resident

    kernel = functools.partial(_centroid_loss_kernel, batch=B, num_classes=K,
                               tiles_per_chunk=tiles_per_chunk)

    psum, reg = pl.pallas_call(
        kernel,
        out_shape=(jax.ShapeDtypeStruct((chunks, 1), jnp.float32),
                   jax.ShapeDtypeStruct((chunks, 1), jnp.float32)),
        grid_spec=pltpu.PrefetchScalarGridSpec(
            num_scalar_prefetch=0,
            grid=(chunks, tiles_per_chunk),
            in_specs=[h_spec, c_spec, y_spec],
            out_specs=[pl.BlockSpec((1, 1), lambda c, t: (c, 0)),
                       pl.BlockSpec((1, 1), lambda c, t: (c, 0))],
            scratch_shapes=[pltpu.VMEM((1, TB), jnp.float32),      # lane-dense partial sum
                            pltpu.VMEM((K_pad, 1), jnp.float32)],  # hoisted ||C_k||^2
        ),
        compiler_params=pltpu.CompilerParams(
            dimension_semantics=("parallel", "arbitrary"),
            vmem_limit_bytes=vmem_limit,
        ),
    )(h, c_p, y2d)

    # Trivial epilogue: combine per-chunk partial sums (mean) and add rho * reg.
    return jnp.sum(psum) / jnp.float32(B) + jnp.float32(rho) * reg[0, 0]


def centroid_loss_ref(h, centers, y, rho=1.0):
    """Pure-JAX reference for correctness check."""
    diff = h[:, None, :] - centers[None, :, :]
    norm_sq = jnp.sum(diff * diff, axis=2)                            # (B, K)
    distance = jnp.take_along_axis(norm_sq, y[:, None], axis=1)[:, 0]
    logsum = jax.scipy.special.logsumexp(-jnp.sqrt(norm_sq), axis=1)
    loss = jnp.mean(distance + logsum)
    cdiff = centers[:, None, :] - centers[None, :, :]
    pdist = jnp.sum(cdiff * cdiff, axis=2)
    K = centers.shape[0]
    pdist = jnp.where(jnp.eye(K, dtype=bool), jnp.inf, pdist)
    reg = jnp.sum(-jnp.min(jnp.log(pdist), axis=-1))
    return loss + rho * reg


if __name__ == "__main__":
    feat_dim = 32
    num_classes = 4

    key = jax.random.PRNGKey(0)
    k_h, k_c, k_y = jax.random.split(key, 3)
    centers = jax.random.normal(k_c, (num_classes, feat_dim), dtype=jnp.float32)

    # 1) tiny batch: single tile (wrapper pads 8 -> 128 rows; negligible).
    batch = 8
    h = jax.random.normal(k_h, (batch, feat_dim), dtype=jnp.float32)
    y = jax.random.randint(k_y, (batch,), 0, num_classes, dtype=jnp.int32)
    out = jax.block_until_ready(centroid_loss(h, centers, y))
    ref = centroid_loss_ref(h, centers, y)
    assert jnp.allclose(out, ref, rtol=1e-4, atol=1e-3), (out, ref)

    # 2) ragged batch with forced small tiles: multi-tile accumulation, masked ragged
    #    tail, two-chunk parallel split including a clamped duplicate tile.
    b2 = 300
    k_h2, k_y2 = jax.random.split(k_h)
    h2 = jax.random.normal(k_h2, (b2, feat_dim), dtype=jnp.float32)
    y2 = jax.random.randint(k_y2, (b2,), 0, num_classes, dtype=jnp.int32)
    out2 = jax.block_until_ready(centroid_loss(h2, centers, y2, max_block_rows=128))
    ref2 = centroid_loss_ref(h2, centers, y2)
    assert jnp.allclose(out2, ref2, rtol=1e-4, atol=1e-3), (out2, ref2)

    # 3) larger un-padded streaming batch with default (generation-aware) tiling.
    b3 = 2000
    k_h3, k_y3 = jax.random.split(k_c)
    h3 = jax.random.normal(k_h3, (b3, feat_dim), dtype=jnp.float32)
    y3 = jax.random.randint(k_y3, (b3,), 0, num_classes, dtype=jnp.int32)
    out3 = jax.block_until_ready(centroid_loss(h3, centers, y3))
    ref3 = centroid_loss_ref(h3, centers, y3)
    assert jnp.allclose(out3, ref3, rtol=1e-4, atol=1e-3), (out3, ref3)

    print("KERNEL_OK")
</pallas_src>

<mosaic_0001>
module attributes {stable_mosaic.version = 11 : i64} {
  func.func @_centroid_loss_kernel(%arg0: i32, %arg1: i32, %arg2: memref<128x32xf32, #tpu.memory_space<vmem>>, %arg3: memref<8x32xf32, #tpu.memory_space<vmem>>, %arg4: memref<1x128xi32, #tpu.memory_space<vmem>>, %arg5: memref<1x1xf32, #tpu.memory_space<vmem>>, %arg6: memref<1x1xf32, #tpu.memory_space<vmem>>, %arg7: memref<1x128xf32, #tpu.memory_space<vmem>>, %arg8: memref<8x1xf32, #tpu.memory_space<vmem>>) attributes {dimension_semantics = [#tpu.dimension_semantics<parallel>, #tpu.dimension_semantics<arbitrary>], iteration_bounds = array<i64: 1, 1>, scalar_prefetch = 0 : i64, scratch_operands = 2 : i64, tpu.core_type = #tpu.core_type<tc>, window_params = [{transform_indices = @transform_0, window_bounds = array<i64: 128, 32>}, {pipeline_mode = #tpu.pipeline_mode<synchronous>, transform_indices = @transform_1, window_bounds = array<i64: 8, 32>}, {transform_indices = @transform_2, window_bounds = array<i64: 1, 128>}, {transform_indices = @transform_3, window_bounds = array<i64: 1, 1>}, {transform_indices = @transform_4, window_bounds = array<i64: 1, 1>}]} {
    %c0_i32 = arith.constant 0 : i32
    %0 = arith.cmpi eq, %arg1, %c0_i32 : i32
    %1 = arith.extui %0 : i1 to i32
    %c0_i32_0 = arith.constant 0 : i32
    %2 = arith.cmpi ne, %1, %c0_i32_0 : i32
    scf.if %2 {
      %cst_24 = arith.constant 0.000000e+00 : f32
      %59 = vector.broadcast %cst_24 : f32 to vector<1x128xf32>
      %c0_25 = arith.constant 0 : index
      %c0_26 = arith.constant 0 : index
      %60 = vector.load %arg7[%c0_25, %c0_26] : memref<1x128xf32, #tpu.memory_space<vmem>>, vector<1x128xf32>
      tpu.vector_store %arg7[%c0_25, %c0_26], %59 {strides = array<i32>} : memref<1x128xf32, #tpu.memory_space<vmem>>, vector<1x128xf32>,
      %c0_27 = arith.constant 0 : index
      %c0_28 = arith.constant 0 : index
      %61 = vector.load %arg3[%c0_27, %c0_28] : memref<8x32xf32, #tpu.memory_space<vmem>>, vector<8x32xf32>
      %62 = arith.mulf %61, %61 : vector<8x32xf32>
      %cst_29 = arith.constant dense<0.000000e+00> : vector<8xf32>
      %63 = vector.multi_reduction <add>, %62, %cst_29 [1] : vector<8x32xf32> to vector<8xf32>
      %64 = vector.shape_cast %63 : vector<8xf32> to vector<8x1xf32>
      %c0_30 = arith.constant 0 : index
      %c0_31 = arith.constant 0 : index
      %65 = vector.load %arg8[%c0_30, %c0_31] : memref<8x1xf32, #tpu.memory_space<vmem>>, vector<8x1xf32>
      tpu.vector_store %arg8[%c0_30, %c0_31], %64 {strides = array<i32>} : memref<8x1xf32, #tpu.memory_space<vmem>>, vector<8x1xf32>,
    } else {
    }
    %c0 = arith.constant 0 : index
    %c0_1 = arith.constant 0 : index
    %3 = vector.load %arg2[%c0, %c0_1] : memref<128x32xf32, #tpu.memory_space<vmem>>, vector<128x32xf32>
    %c0_2 = arith.constant 0 : index
    %c0_3 = arith.constant 0 : index
    %4 = vector.load %arg4[%c0_2, %c0_3] : memref<1x128xi32, #tpu.memory_space<vmem>>, vector<1x128xi32>
    %c0_4 = arith.constant 0 : index
    %c0_5 = arith.constant 0 : index
    %5 = vector.load %arg3[%c0_4, %c0_5] : memref<8x32xf32, #tpu.memory_space<vmem>>, vector<8x32xf32>
    %cst = arith.constant dense<0.000000e+00> : vector<8x128xf32>
    %6 = tpu.matmul %5, %3, %cst {dimension_numbers = #tpu.dot_dimension_numbers<[1], [1], [0], [0], [0, 0, 1, 0], [], []>} : vector<8x32xf32>, vector<128x32xf32>, vector<8x128xf32> -> vector<8x128xf32>
    %7 = arith.mulf %3, %3 : vector<128x32xf32>
    %cst_6 = arith.constant 1.000000e+00 : f32
    %8 = vector.broadcast %cst_6 : f32 to vector<8x32xf32>
    %cst_7 = arith.constant dense<0.000000e+00> : vector<8x128xf32>
    %9 = tpu.matmul %8, %7, %cst_7 {dimension_numbers = #tpu.dot_dimension_numbers<[1], [1], [0], [0], [0, 0, 1, 0], [], []>} : vector<8x32xf32>, vector<128x32xf32>, vector<8x128xf32> -> vector<8x128xf32>
    %c0_8 = arith.constant 0 : index
    %c0_9 = arith.constant 0 : index
    %10 = vector.load %arg8[%c0_8, %c0_9] : memref<8x1xf32, #tpu.memory_space<vmem>>, vector<8x1xf32>
    %11 = vector.broadcast %10 : vector<8x1xf32> to vector<8x128xf32>
    %12 = arith.addf %11, %9 : vector<8x128xf32>
    %cst_10 = arith.constant 2.000000e+00 : f32
    %13 = vector.broadcast %cst_10 : f32 to vector<8x128xf32>
    %14 = arith.mulf %13, %6 : vector<8x128xf32>
    %15 = arith.subf %12, %14 : vector<8x128xf32>
    %cst_11 = arith.constant 0.000000e+00 : f32
    %16 = vector.broadcast %cst_11 : f32 to vector<8x128xf32>
    %17 = arith.maximumf %15, %16 : vector<8x128xf32>
    %18 = tpu.iota {dimensions = array<i32: 0>} : vector<8x128xi32>
    %19 = vector.broadcast %4 : vector<1x128xi32> to vector<8x128xi32>
    %20 = arith.cmpi eq, %18, %19 : vector<8x128xi32>
    %21 = arith.extui %20 : vector<8x128xi1> to vector<8x128xi32>
    %22 = arith.sitofp %21 : vector<8x128xi32> to vector<8x128xf32>
    %23 = arith.mulf %17, %22 : vector<8x128xf32>
    %cst_12 = arith.constant dense<0.000000e+00> : vector<128xf32>
    %24 = vector.multi_reduction <add>, %23, %cst_12 [0] : vector<8x128xf32> to vector<128xf32>
    %25 = vector.shape_cast %24 : vector<128xf32> to vector<1x128xf32>
    %26 = math.sqrt %17 : vector<8x128xf32>
    %cst_13 = arith.constant 0.000000e+00 : f32
    %27 = vector.broadcast %cst_13 : f32 to vector<8x128xf32>
    %28 = arith.subf %27, %26 : vector<8x128xf32>
    %c4_i32 = arith.constant 4 : i32
    %29 = vector.broadcast %c4_i32 : i32 to vector<8x128xi32>
    %30 = arith.cmpi slt, %18, %29 : vector<8x128xi32>
    %cst_14 = arith.constant 0xFF800000 : f32
    %31 = vector.broadcast %cst_14 : f32 to vector<8x128xf32>
    %32 = arith.select %30, %28, %31 : vector<8x128xi1>, vector<8x128xf32>
    %cst_15 = arith.constant dense<0xFF800000> : vector<128xf32>
    %33 = vector.multi_reduction <maximumf>, %32, %cst_15 [0] : vector<8x128xf32> to vector<128xf32>
    %34 = vector.shape_cast %33 : vector<128xf32> to vector<1x128xf32>
    %35 = vector.broadcast %34 : vector<1x128xf32> to vector<8x128xf32>
    %36 = arith.subf %32, %35 : vector<8x128xf32>
    %37 = math.exp %36 : vector<8x128xf32>
    %cst_16 = arith.constant dense<0.000000e+00> : vector<128xf32>
    %38 = vector.multi_reduction <add>, %37, %cst_16 [0] : vector<8x128xf32> to vector<128xf32>
    %39 = vector.shape_cast %38 : vector<128xf32> to vector<1x128xf32>
    %40 = math.log %39 : vector<1x128xf32>
    %41 = arith.addf %40, %34 : vector<1x128xf32>
    %c1_i32 = arith.constant 1 : i32
    %42 = arith.muli %arg0, %c1_i32 : i32
    %43 = arith.addi %42, %arg1 : i32
    %44 = tpu.iota {dimensions = array<i32: 1>} : vector<1x128xi32>
    %c128_i32 = arith.constant 128 : i32
    %45 = arith.muli %43, %c128_i32 : i32
    %46 = vector.broadcast %45 : i32 to vector<1x128xi32>
    %47 = arith.addi %46, %44 : vector<1x128xi32>
    %c8_i32 = arith.constant 8 : i32
    %48 = vector.broadcast %c8_i32 : i32 to vector<1x128xi32>
    %49 = arith.cmpi slt, %47, %48 : vector<1x128xi32>
    %c0_17 = arith.constant 0 : index
    %c0_18 = arith.constant 0 : index
    %50 = vector.load %arg7[%c0_17, %c0_18] : memref<1x128xf32, #tpu.memory_space<vmem>>, vector<1x128xf32>
    %51 = arith.addf %25, %41 : vector<1x128xf32>
    %cst_19 = arith.constant 0.000000e+00 : f32
    %52 = vector.broadcast %cst_19 : f32 to vector<1x128xf32>
    %53 = arith.select %49, %51, %52 : vector<1x128xi1>, vector<1x128xf32>
    %54 = arith.addf %50, %53 : vector<1x128xf32>
    %c0_20 = arith.constant 0 : index
    %c0_21 = arith.constant 0 : index
    %55 = vector.load %arg7[%c0_20, %c0_21] : memref<1x128xf32, #tpu.memory_space<vmem>>, vector<1x128xf32>
    tpu.vector_store %arg7[%c0_20, %c0_21], %54 {strides = array<i32>} : memref<1x128xf32, #tpu.memory_space<vmem>>, vector<1x128xf32>,
    %c0_i32_22 = arith.constant 0 : i32
    %56 = arith.cmpi eq, %arg1, %c0_i32_22 : i32
    %57 = arith.extui %56 : i1 to i32
    %c0_i32_23 = arith.constant 0 : i32
    %58 = arith.cmpi ne, %57, %c0_i32_23 : i32
    scf.if %58 {
      %c0_24 = arith.constant 0 : index
      %c0_25 = arith.constant 0 : index
      %59 = vector.load %arg7[%c0_24, %c0_25] : memref<1x128xf32, #tpu.memory_space<vmem>>, vector<1x128xf32>
      %60 = vector.shape_cast %59 : vector<1x128xf32> to vector<1x1x128xf32>
      %cst_26 = arith.constant dense<0.000000e+00> : vector<1xf32>
      %61 = vector.multi_reduction <add>, %60, %cst_26 [1, 2] : vector<1x1x128xf32> to vector<1xf32>
      %62 = vector.shape_cast %61 : vector<1xf32> to vector<1x1x1xf32>
      %63 = vector.extract %62[0, 0, 0] : f32 from vector<1x1x1xf32>
      %64 = vector.broadcast %63 : f32 to vector<1x1xf32>
      %c0_27 = arith.constant 0 : index
      %c0_28 = arith.constant 0 : index
      %65 = vector.load %arg5[%c0_27, %c0_28] : memref<1x1xf32, #tpu.memory_space<vmem>>, vector<1x1xf32>
      tpu.vector_store %arg5[%c0_27, %c0_28], %64 {strides = array<i32>} : memref<1x1xf32, #tpu.memory_space<vmem>>, vector<1x1xf32>,
      %c0_29 = arith.constant 0 : index
      %c0_30 = arith.constant 0 : index
      %66 = vector.load %arg3[%c0_29, %c0_30] : memref<8x32xf32, #tpu.memory_space<vmem>>, vector<8x32xf32>
      %cst_31 = arith.constant dense<0.000000e+00> : vector<8x8xf32>
      %67 = tpu.matmul %66, %66, %cst_31 {dimension_numbers = #tpu.dot_dimension_numbers<[1], [1], [0], [0], [0, 0, 1, 0], [], []>} : vector<8x32xf32>, vector<8x32xf32>, vector<8x8xf32> -> vector<8x8xf32>
      %c0_32 = arith.constant 0 : index
      %c0_33 = arith.constant 0 : index
      %68 = vector.load %arg8[%c0_32, %c0_33] : memref<8x1xf32, #tpu.memory_space<vmem>>, vector<8x1xf32>
      %69 = tpu.transpose %68, [1, 0] : vector<8x1xf32> -> vector<1x8xf32>
      %70 = vector.broadcast %68 : vector<8x1xf32> to vector<8x8xf32>
      %71 = vector.broadcast %69 : vector<1x8xf32> to vector<8x8xf32>
      %72 = arith.addf %70, %71 : vector<8x8xf32>
      %cst_34 = arith.constant 2.000000e+00 : f32
      %73 = vector.broadcast %cst_34 : f32 to vector<8x8xf32>
      %74 = arith.mulf %73, %67 : vector<8x8xf32>
      %75 = arith.subf %72, %74 : vector<8x8xf32>
      %cst_35 = arith.constant 0.000000e+00 : f32
      %76 = vector.broadcast %cst_35 : f32 to vector<8x8xf32>
      %77 = arith.maximumf %75, %76 : vector<8x8xf32>
      %78 = tpu.iota {dimensions = array<i32: 0>} : vector<8x8xi32>
      %79 = tpu.iota {dimensions = array<i32: 1>} : vector<8x8xi32>
      %80 = arith.cmpi eq, %78, %79 : vector<8x8xi32>
      %c4_i32_36 = arith.constant 4 : i32
      %81 = vector.broadcast %c4_i32_36 : i32 to vector<8x8xi32>
      %82 = arith.cmpi sge, %78, %81 : vector<8x8xi32>
      %83 = arith.ori %80, %82 : vector<8x8xi1>
      %c4_i32_37 = arith.constant 4 : i32
      %84 = vector.broadcast %c4_i32_37 : i32 to vector<8x8xi32>
      %85 = arith.cmpi sge, %79, %84 : vector<8x8xi32>
      %86 = arith.ori %83, %85 : vector<8x8xi1>
      %cst_38 = arith.constant 0x7F800000 : f32
      %87 = vector.broadcast %cst_38 : f32 to vector<8x8xf32>
      %88 = arith.select %86, %87, %77 : vector<8x8xi1>, vector<8x8xf32>
      %cst_39 = arith.constant dense<0x7F800000> : vector<8xf32>
      %89 = vector.multi_reduction <minimumf>, %88, %cst_39 [1] : vector<8x8xf32> to vector<8xf32>
      %90 = vector.shape_cast %89 : vector<8xf32> to vector<8x1xf32>
      %91 = math.log %90 : vector<8x1xf32>
      %92 = tpu.iota {dimensions = array<i32: 0>} : vector<8x1xi32>
      %c4_i32_40 = arith.constant 4 : i32
      %93 = vector.broadcast %c4_i32_40 : i32 to vector<8x1xi32>
      %94 = arith.cmpi slt, %92, %93 : vector<8x1xi32>
      %cst_41 = arith.constant 0.000000e+00 : f32
      %95 = vector.broadcast %cst_41 : f32 to vector<8x1xf32>
      %96 = arith.subf %95, %91 : vector<8x1xf32>
      %cst_42 = arith.constant 0.000000e+00 : f32
      %97 = vector.broadcast %cst_42 : f32 to vector<8x1xf32>
      %98 = arith.select %94, %96, %97 : vector<8x1xi1>, vector<8x1xf32>
      %99 = vector.shape_cast %98 : vector<8x1xf32> to vector<1x8x1xf32>
      %cst_43 = arith.constant dense<0.000000e+00> : vector<1xf32>
      %100 = vector.multi_reduction <add>, %99, %cst_43 [1, 2] : vector<1x8x1xf32> to vector<1xf32>
      %101 = vector.shape_cast %100 : vector<1xf32> to vector<1x1x1xf32>
      %102 = vector.extract %101[0, 0, 0] : f32 from vector<1x1x1xf32>
      %103 = vector.broadcast %102 : f32 to vector<1x1xf32>
      %c0_44 = arith.constant 0 : index
      %c0_45 = arith.constant 0 : index
      %104 = vector.load %arg6[%c0_44, %c0_45] : memref<1x1xf32, #tpu.memory_space<vmem>>, vector<1x1xf32>
      tpu.vector_store %arg6[%c0_44, %c0_45], %103 {strides = array<i32>} : memref<1x1xf32, #tpu.memory_space<vmem>>, vector<1x1xf32>,
    } else {
    }
    return
  }
  func.func @transform_0(%arg0: i32, %arg1: i32) -> (i32, i32) {
    %c1_i32 = arith.constant 1 : i32
    %0 = arith.muli %arg0, %c1_i32 : i32
    %1 = arith.addi %0, %arg1 : i32
    %c0_i32 = arith.constant 0 : i32
    %2 = arith.minsi %1, %c0_i32 : i32
    %c0_i32_0 = arith.constant 0 : i32
    %c0_i32_1 = arith.constant 0 : i32
    return %2, %c0_i32_0 : i32, i32
  }
  func.func @transform_1(%arg0: i32, %arg1: i32) -> (i32, i32) {
    %c0_i32 = arith.constant 0 : i32
    %c0_i32_0 = arith.constant 0 : i32
    %c0_i32_1 = arith.constant 0 : i32
    return %c0_i32, %c0_i32_0 : i32, i32
  }
  func.func @transform_2(%arg0: i32, %arg1: i32) -> (i32, i32) {
    %c1_i32 = arith.constant 1 : i32
    %0 = arith.muli %arg0, %c1_i32 : i32
    %1 = arith.addi %0, %arg1 : i32
    %c0_i32 = arith.constant 0 : i32
    %2 = arith.minsi %1, %c0_i32 : i32
    %c0_i32_0 = arith.constant 0 : i32
    %c0_i32_1 = arith.constant 0 : i32
    return %c0_i32_0, %2 : i32, i32
  }
  func.func @transform_3(%arg0: i32, %arg1: i32) -> (i32, i32) {
    %c0_i32 = arith.constant 0 : i32
    %c0_i32_0 = arith.constant 0 : i32
    return %arg0, %c0_i32 : i32, i32
  }
  func.func @transform_4(%arg0: i32, %arg1: i32) -> (i32, i32) {
    %c0_i32 = arith.constant 0 : i32
    %c0_i32_0 = arith.constant 0 : i32
    return %arg0, %c0_i32 : i32, i32
  }
}

</mosaic_0001>

<bundles_post_ra>
// kernel: tpu_custom_call.1
= control target key start
LH: loop header
LB: loop body
LE: loop exit
PB: predicated region body
PF: predicated region fallthrough
CT: control target
= control target key end

     0   :  { %10 = vsyncpa [#allocation5], 0  ;;  %vm81_vm0 = vcmask 261120   ;;  %s742_s0 = inlined_call_operand.vmem [shape: f32[128,32], index: 0, kind: input, shape index: {}]   ;;  %s743_s1 = inlined_call_operand.vmem [shape: f32[8,32], index: 1, kind: input, shape index: {}]   ;;  %s744_s2 = inlined_call_operand.vmem [shape: s32[1,128], index: 2, kind: input, shape index: {}]   ;;  %s745_s3 = inlined_call_operand.hbm [shape: f32[1,1], index: 3, kind: output, shape index: {0}]   ;;  %s746_s4 = inlined_call_operand.hbm [shape: f32[1,1], index: 4, kind: output, shape index: {1}]  }
   0x1   :  { %v627_v0 = vld [vmem:[%s743_s1] sm:$0xff]  ;;  %v102_v1 = vld [vmem:[%s742_s0 + $0x78] sm:$0xff]  ;;  %v101_v2 = vld [vmem:[%s742_s0 + $0x70] sm:$0xff] }
   0x2   :  { %v80_v3 = vmul.f32 %v627_v0, %v627_v0  ;;  %485 = vmatpush.xpose.msk.msra.mxu0 %vm81_vm0, %v102_v1  ;;  %v192_v4 = vmul.f32 %v102_v1, %v102_v1  ;;  %520 = vmatpush.xpose.msk.msra.mxu2 %vm81_vm0, %v627_v0  ;;  %v191_v6 = vmul.f32 %v101_v2, %v101_v2  ;;  %v100_v7 = vld [vmem:[%s742_s0 + $0x68] sm:$0xff] }
   0x4   :  { %v82_v5 = vsel %vm81_vm0, %v80_v3, 0.0  ;;  %502 = vmatpush.xpose.msk.msra.mxu1 %vm81_vm0, %v192_v4 }
   0x5   :  { %83 = vadd.xlane.f32.xlu0 %v82_v5  ;;  %521 = vmatmul.msk.f32.vlgmr.msra.gmra.mxu2 %vm81_vm0, %v627_v0 }
   0x6   :  { %11 = vsyncpa [#allocation7], 0  ;;  %486 = vmatpush.xpose.msk.msra.mxu0 %vm81_vm0, %v101_v2  ;;  %v190_v8 = vmul.f32 %v100_v7, %v100_v7  ;;  %v99_v9 = vld [vmem:[%s742_s0 + $0x60] sm:$0xff]  ;;  %v98_v11 = vld [vmem:[%s742_s0 + $0x58] sm:$0xff]  ;;  %v594_v35 = vmov 1.0   ;;  %v595_v36 = vmov 0   ;;  %v274_v52 = vlaneseq }
   0x7   :  { %v189_v10 = vmul.f32 %v99_v9, %v99_v9  ;;  %v188_v12 = vmul.f32 %v98_v11, %v98_v11  ;;  %v97_v13 = vld [vmem:[%s742_s0 + $0x50] sm:$0xff]  ;;  %v96_v15 = vld [vmem:[%s742_s0 + $0x48] sm:$0xff]  ;;  %v95_v17 = vld [vmem:[%s742_s0 + $0x40] sm:$0xff]  ;;  %532 = vset.pattern.permute.xlu1 %v595_v36  ;;  %531 = vset.pattern.permute.xlu0 %v595_v36  ;;  %vm85_vm1 = vcmask 7168   ;;  %v596_v39 = vmov 0.0   ;;  %s451_s25 = sshll.u32 %s745_s3, 4  ;;  %s452_s25 = int_to_ptr.hbm [resolvable:$true] %s451_s25 }
   0x8   :  { %503 = vmatpush.xpose.msk.msra.mxu1 %vm81_vm0, %v191_v6  ;;  %v187_v14 = vmul.f32 %v97_v13, %v97_v13  ;;  %v186_v16 = vmul.f32 %v96_v15, %v96_v15  ;;  %v185_v18 = vmul.f32 %v95_v17, %v95_v17  ;;  %v94_v19 = vld [vmem:[%s742_s0 + $0x38] sm:$0xff]  ;;  %v93_v21 = vld [vmem:[%s742_s0 + $0x30] sm:$0xff]  ;;  %v92_v23 = vld [vmem:[%s742_s0 + $0x28] sm:$0xff]  ;;  %78 = vst [vmem:[#allocation2] sm:$0x1] %v596_v39  ;;  %v720_v55 = vshrl.u32 %v274_v52, 7 }
   0x9   :  { %v184_v20 = vmul.f32 %v94_v19, %v94_v19  ;;  %v183_v22 = vmul.f32 %v93_v21, %v93_v21  ;;  %v182_v24 = vmul.f32 %v92_v23, %v92_v23  ;;  %v91_v25 = vld [vmem:[%s742_s0 + $0x20] sm:$0xff]  ;;  %v90_v27 = vld [vmem:[%s742_s0 + $0x18] sm:$0xff]  ;;  %v89_v29 = vld [vmem:[%s742_s0 + $0x10] sm:$0xff]  ;;  %vm423_vm12 = vcmask 64512   ;;  %s598_s27 = smov [#allocation6]   ;;  %s462_s30 = sshll.u32 %s746_s4, 4  ;;  %s463_s30 = int_to_ptr.hbm [resolvable:$true] %s462_s30 }
   0xa   :  { %487 = vmatpush.xpose.msk.msra.mxu0 %vm81_vm0, %v100_v7  ;;  %v181_v26 = vmul.f32 %v91_v25, %v91_v25  ;;  %v180_v28 = vmul.f32 %v90_v27, %v90_v27  ;;  %v179_v30 = vmul.f32 %v89_v29, %v89_v29  ;;  %v88_v31 = vld [vmem:[%s742_s0 + $0x8] sm:$0xff]  ;;  %v87_v33 = vld [vmem:[%s742_s0] sm:$0xff]  ;;  %vm300_vm4 = vcmp.lt.s32.totalorder %v720_v55, 4  ;;  %s460_s28 = sshll.u32 %s598_s27, 4  ;;  %s461_s28 = int_to_ptr.vmem [resolvable:$true] %s460_s28 }
   0xb   :  { %v178_v32 = vmul.f32 %v88_v31, %v88_v31  ;;  %v177_v34 = vmul.f32 %v87_v33, %v87_v33  ;;  %v533_v2 = vld [vmem:[%s744_s2] ss:$0 sm:$0xff]  ;;  %vm418_vm8 = vcmp.ge.s32.totalorder %v720_v55, 4  ;;  %vm336_vm13 = vcmask 1040384   ;;  %s597_s2 = smov [#allocation4]  }
   0xc   :  { %504 = vmatpush.xpose.msk.msra.mxu1 %vm81_vm0, %v190_v8  ;;  %vm277_vm5 = vcmp.eq.s32.totalorder %v720_v55, %v533_v2  ;;  %s449_s22 = sshll.u32 %s597_s2, 4  ;;  %vm348_vm14 = vcmask 0   ;;  %s450_s22 = int_to_ptr.vmem [resolvable:$true] %s449_s22 }
   0xd   :  { %v519_v6 = vsel %vm277_vm5, 1.0, %v596_v39 }
   0xe   :  { %488 = vmatpush.xpose.msk.msra.mxu0 %vm81_vm0, %v99_v9 }
  0x10   :  { %505 = vmatpush.xpose.msk.msra.mxu1 %vm81_vm0, %v189_v10 }
  0x12   :  { %489 = vmatpush.xpose.msk.msra.mxu0 %vm81_vm0, %v98_v11 }
  0x14   :  { %506 = vmatpush.xpose.msk.msra.mxu1 %vm81_vm0, %v188_v12 }
  0x16   :  { %490 = vmatpush.xpose.msk.msra.mxu0 %vm81_vm0, %v97_v13 }
  0x18   :  { %507 = vmatpush.xpose.msk.msra.mxu1 %vm81_vm0, %v187_v14 }
  0x1a   :  { %491 = vmatpush.xpose.msk.msra.mxu0 %vm81_vm0, %v96_v15 }
  0x1c   :  { %508 = vmatpush.xpose.msk.msra.mxu1 %vm81_vm0, %v186_v16 }
  0x1e   :  { %492 = vmatpush.xpose.msk.msra.mxu0 %vm81_vm0, %v95_v17 }
  0x20   :  { %509 = vmatpush.xpose.msk.msra.mxu1 %vm81_vm0, %v185_v18 }
  0x22   :  { %493 = vmatpush.xpose.msk.msra.mxu0 %vm81_vm0, %v94_v19 }
  0x24   :  { %510 = vmatpush.xpose.msk.msra.mxu1 %vm81_vm0, %v184_v20 }
  0x26   :  { %494 = vmatpush.xpose.msk.msra.mxu0 %vm81_vm0, %v93_v21  ;;  %v322_v21 = vand.u32 127, %v274_v52 }
  0x28   :  { %511 = vmatpush.xpose.msk.msra.mxu1 %vm81_vm0, %v183_v22  ;;  %vm326_vm6 = vcmp.lt.s32.totalorder %v322_v21, 8  ;;  %vm417_vm7 = vcmp.eq.s32.totalorder %v720_v55, %v322_v21  ;;  %vm420_vm10 = vcmp.ge.s32.totalorder %v322_v21, 4 }
  0x29   :  { %vm419_vm9 = vmor %vm417_vm7, %vm418_vm8 }
  0x2a   :  { %495 = vmatpush.xpose.msk.msra.mxu0 %vm81_vm0, %v92_v23  ;;  %vm421_vm11 = vmor %vm419_vm9, %vm420_vm10 }
  0x2c   :  { %512 = vmatpush.xpose.msk.msra.mxu1 %vm81_vm0, %v182_v24 }
  0x2e   :  { %496 = vmatpush.xpose.msk.msra.mxu0 %vm81_vm0, %v91_v25  ;;  %v327_v25 = vld [vmem:[#allocation2] sm:$0x1] }
  0x30   :  { %513 = vmatpush.xpose.msk.msra.mxu1 %vm81_vm0, %v181_v26 }
  0x32   :  { %497 = vmatpush.xpose.msk.msra.mxu0 %vm81_vm0, %v90_v27 }
  0x34   :  { %514 = vmatpush.xpose.msk.msra.mxu1 %vm81_vm0, %v180_v28 }
  0x36   :  { %498 = vmatpush.xpose.msk.msra.mxu0 %vm81_vm0, %v89_v29 }
  0x38   :  { %515 = vmatpush.xpose.msk.msra.mxu1 %vm81_vm0, %v179_v30 }
  0x3a   :  { %499 = vmatpush.xpose.msk.msra.mxu0 %vm81_vm0, %v88_v31 }
  0x3c   :  { %516 = vmatpush.xpose.msk.msra.mxu1 %vm81_vm0, %v178_v32 }
  0x3e   :  { %500 = vmatpush.xpose.msk.msra.mxu0 %vm81_vm0, %v87_v33 }
  0x40   :  { %517 = vmatpush.xpose.msk.msra.mxu1 %vm81_vm0, %v177_v34 }
  0x41   :  { %501 = vmatmul.msk.f32.vlgmr.msra.gmra.mxu0 %vm81_vm0, %v627_v0 }
  0x43   :  { %518 = vmatmul.msk.f32.vlgmr.msra.gmra.mxu1 %vm81_vm0, %v594_v35 }
  0x78   :  { %v84_v37 = vpop.xlane.xlu0 %83 }
  0x79   :  { %86 = vst.msk [vmem:[#allocation3] sm:$0xff] %vm85_vm1, %v84_v37 }
  0x80   :  { %v374_v38 = vld [vmem:[#allocation3] sm:$0xff] }
  0x81   :  { %409 = vperm.xlu1 %532, %v374_v38   ;;  %267 = vperm.xlu0 %531, %v374_v38  }
  0x88   :  { %v371_v30 = vpop.f32.mrf.mxu2 }
  0x89   :  { %v414_v33 = vmul.f32 2.0, %v371_v30 }
  0xb6   :  { %375 = vxpose.xlu1.b32.start.end [1/1] (short) (narrow) %v374_v38, 8 }
  0xbe   :  { %v174_v40 = vpop.f32.mrf.mxu0 }
  0xbf   :  { %v271_v42 = vmul.f32 2.0, %v174_v40 }
  0xc0   :  { %v261_v41 = vpop.f32.mrf.mxu1 }
  0xf3   :  { %v268_v43 = vpop.permute.xlu0 %267  ;;  %v410_v29 = vpop.permute.xlu1 %409 }
  0xf4   :  { %v270_v44 = vadd.f32 %v268_v43, %v261_v41 }
  0xf6   :  { %v272_v45 = vsub.f32 %v270_v44, %v271_v42 }
  0xf8   :  { %v273_v46 = vmax.f32 %v272_v45, 0.0 }
  0xfa   :  { %534 = vrsqrt.f32 %v273_v46  ;;  %vm294_vm2 = vcmp.eq.f32.partialorder %v273_v46, inf  ;;  %v297_v56 = vand.u32 2147483648, %v273_v46  ;;  %vm296_vm3 = vcmp.eq.f32.partialorder %v273_v46, 0.0 }
  0xfb   :  { %v280_v7 = vmul.f32 %v519_v6, %v273_v46 }
  0xfd   :  { %v281_v10 = vrot.slane %v280_v7, 4 }
  0xff   :  { %v282_v13 = vadd.f32 %v281_v10, %v280_v7 }
 0x100   :  { %v535_v47 = vpop.eup %534 }
 0x101   :  { %v288_v48 = vmul.f32 %v535_v47, %v273_v46  ;;  %v283_v16 = vrot.slane %v282_v13, 2 }
 0x103   :  { %v289_v49 = vmul.f32 %v535_v47, %v288_v48  ;;  %v284_v18 = vadd.f32 %v283_v16, %v282_v13 }
 0x105   :  { %v290_v50 = vmul.f32 0.5, %v289_v49  ;;  %v285_v19 = vrot.slane %v284_v18, 1 }
 0x107   :  { %v291_v51 = vsub.f32 1.5, %v290_v50  ;;  %v286_v23 = vadd.f32 %v285_v19, %v284_v18 }
 0x109   :  { %v292_v53 = vmul.f32 %v535_v47, %v291_v51 }
 0x10b   :  { %v293_v54 = vmul.f32 %v292_v53, %v273_v46 }
 0x10d   :  { %v295_v57 = vsel %vm294_vm2, %v273_v46, %v293_v54 }
 0x10e   :  { %v298_v58 = vsel %vm296_vm3, %v297_v56, %v295_v57 }
 0x10f   :  { %v299_v59 = vsub.f32 0.0, %v298_v58 }
 0x111   :  { %v301_v60 = vsel %vm300_vm4, %v299_v59, -inf }
 0x112   :  { %v302_v61 = vrot.slane %v301_v60, 4 }
 0x114   :  { %v303_v62 = vmax.f32 %v301_v60, %v302_v61 }
 0x116   :  { %v304_v63 = vrot.slane %v303_v62, 2 }
 0x118   :  { %v305_v0 = vmax.f32 %v303_v62, %v304_v63 }
 0x11a   :  { %v306_v1 = vrot.slane %v305_v0, 1 }
 0x11c   :  { %v307_v3 = vmax.f32 %v305_v0, %v306_v1 }
 0x11e   :  { %v308_v4 = vsub.f32 %v301_v60, %v307_v3 }
 0x120   :  { %v309_v5 = vmul.f32 1.442695, %v308_v4 }
 0x122   :  { %536 = vpow2.f32 %v309_v5 }
 0x128   :  { %v537_v8 = vpop.eup %536 }
 0x129   :  { %v311_v9 = vrot.slane %v537_v8, 4 }
 0x12b   :  { %v312_v11 = vadd.f32 %v537_v8, %v311_v9 }
 0x12d   :  { %v313_v12 = vrot.slane %v312_v11, 2 }
 0x12f   :  { %v314_v14 = vadd.f32 %v313_v12, %v312_v11 }
 0x131   :  { %v315_v15 = vrot.slane %v314_v14, 1 }
 0x133   :  { %v316_v17 = vadd.f32 %v315_v15, %v314_v14 }
 0x135   :  { %538 = vlog2.f32 %v316_v17 }
 0x13b   :  { %v539_v20 = vpop.eup %538 }
 0x13c   :  { %v318_v22 = vmul.f32 0.6931472, %v539_v20 }
 0x13e   :  { %v319_v24 = vadd.f32 %v318_v22, %v307_v3 }
 0x140   :  { %v328_v26 = vadd.f32 %v319_v24, %v286_v23 }
 0x142   :  { %v329_v27 = vsel %vm326_vm6, %v328_v26, 0.0 }
 0x143   :  { %v330_v28 = vadd.f32 %v329_v27, %v327_v25 }
 0x145   :  { %331 = vst [vmem:[#allocation2] sm:$0x1] %v330_v28 }
 0x14c   :  { %v335_v39 = vld [vmem:[#allocation2] sm:$0x1] }
 0x14d   :  { %v337_v40 = vsel %vm336_vm13, %v335_v39, 0.0 }
 0x15a   :  { %v391_v31 = vpop.trf.xlu1 }
 0x15b   :  { %v412_v32 = vperm.slane %v391_v31, 0 }
 0x15d   :  { %v413_v34 = vadd.f32 %v412_v32, %v410_v29 }
 0x15f   :  { %v415_v35 = vsub.f32 %v413_v34, %v414_v33 }
 0x161   :  { %v416_v36 = vmax.f32 %v415_v35, 0.0 }
 0x163   :  { %v422_v37 = vsel %vm421_vm11, inf, %v416_v36 }
 0x164   :  { %v424_v38 = vsel %vm423_vm12, %v422_v37, inf }
 0x165   :  { %425 = vmin.xlane.f32.xlu2 %v424_v38 }
 0x16d   :  { %338 = vadd.xlane.f32.xlu2 %v337_v40 }
 0x1d8   :  { %v426_v41 = vpop.xlane.xlu2 %425 }
 0x1d9   :  { %540 = vlog2.f32 %v426_v41 }
 0x1df   :  { %v541_v42 = vpop.eup %540 }
 0x1e0   :  { %v428_v43 = vmul.f32 0.6931472, %v541_v42  ;;  %v339_v44 = vpop.xlane.xlu2 %338 }
 0x1e1   :  { %v340_v45 = vrot.slane %v339_v44, 4 }
 0x1e2   :  { %v429_v46 = vsub.f32 0.0, %v428_v43 }
 0x1e3   :  { %v341_v47 = vadd.f32 %v340_v45, %v339_v44 }
 0x1e4   :  { %v430_v48 = vsel %vm300_vm4, %v429_v46, 0.0 }
 0x1e5   :  { %v342_v49 = vrot.slane %v341_v47, 2  ;;  %v432_v50 = vsel %vm85_vm1, %v430_v48, 0.0 }
 0x1e6   :  { %433 = vadd.xlane.f32.xlu2 %v432_v50 }
 0x1e7   :  { %v343_v51 = vadd.f32 %v342_v49, %v341_v47 }
 0x1e9   :  { %v344_v52 = vrot.slane %v343_v51, 1 }
 0x1eb   :  { %v345_v53 = vadd.f32 %v344_v52, %v343_v51 }
 0x1ed   :  { %522 = vpush %v345_v53 }
 0x21e   :  { %s523_s26 = spop %522 }
 0x21f   :  { %v347_v54 = vstv %s523_s26 }
 0x220   :  { %349 = vst.msk [vmem:[#allocation4] sm:$0x1] %vm348_vm14, %v347_v54 }
 0x221   :  { %454 = dma.vmem_to_hbm [thread:$0]  %s450_s22, 16, %s452_s25, [#allocation5]  }
 0x259   :  { %v434_v55 = vpop.xlane.xlu2 %433 }
 0x25a   :  { %v435_v56 = vrot.slane %v434_v55, 4 }
 0x25c   :  { %v436_v57 = vadd.f32 %v435_v56, %v434_v55 }
 0x25e   :  { %v437_v58 = vrot.slane %v436_v57, 2 }
 0x260   :  { %v438_v59 = vadd.f32 %v437_v58, %v436_v57 }
 0x262   :  { %v439_v60 = vrot.slane %v438_v59, 1 }
 0x264   :  { %v440_v61 = vadd.f32 %v439_v60, %v438_v59 }
 0x266   :  { %524 = vpush %v440_v61 }
 0x297   :  { %s525_s5 = spop %524 }
 0x298   :  { %v442_v62 = vstv %s525_s5 }
 0x299   :  { %443 = vst.msk [vmem:[#allocation6] sm:$0x1] %vm348_vm14, %v442_v62 }
 0x29a   :  { %465 = dma.vmem_to_hbm [thread:$0]  %s461_s28, 16, %s463_s30, [#allocation7]  }
 0x29b   :  { %590 = dma.done.wait [#allocation5], 16  }
 0x29c   :  { %591 = vsyncadd [#allocation5], 4294967280 }
 0x29d   :  { %592 = dma.done.wait [#allocation7], 16  }
 0x29e   :  { %593 = vsyncadd [#allocation7], 4294967280 }
 0x29f   :  { %474 = vsyncpa [#allocation5], 1 }
 0x2a0   :  { %475 = vsyncpa [#allocation7], 1 }

</bundles_post_ra>
